<compile_context>
chip_gen: v5e
topology: v5e:2x2
jax: 0.10.0
libtpu: 0.0.40
codegen_flags: <defaults>
</compile_context>

<pallas_src>
import functools

import jax
import jax.numpy as jnp
from jax.experimental import pallas as pl
from jax.experimental.pallas import tpu as pltpu

LANES = 128
SUBLANES = 8
MAX_TILE_ROWS = 2048  # 2048 x 128 x 4B = 1 MiB per f32 input tile


def _round_up(x, m):
    return ((x + m - 1) // m) * m


def _make_dice_kernel(tile_rows, valid_rows, need_mask):
    """Build the kernel closure for a given static tile size / row count."""

    def kernel(score_ref, target_ref, out_ref, acc_ref):
        i = pl.program_id(0)

        @pl.when(i == 0)
        def _():
            acc_ref[...] = jnp.zeros_like(acc_ref)

        s = score_ref[...].astype(jnp.float32)
        t = target_ref[...].astype(jnp.float32)  # target = target.float()

        if need_mask:
            # Rows past `valid_rows` come from Pallas' partial-block overhang
            # (undefined contents) -> zero them out before accumulating.
            row_ids = i * tile_rows + jax.lax.broadcasted_iota(
                jnp.int32, (tile_rows, LANES), 0
            )
            valid = row_ids < valid_rows
            s = jnp.where(valid, s, 0.0)
            t = jnp.where(valid, t, 0.0)

        # Vector accumulation: fold the (tile_rows, 128) tile down to (8, 128)
        # with pure vreg adds (no XLU), then add into the persistent VMEM acc.
        st = s * t
        acc_ref[0] += st.reshape(-1, SUBLANES, LANES).sum(axis=0)  # intersect
        acc_ref[1] += t.reshape(-1, SUBLANES, LANES).sum(axis=0)   # y_sum
        acc_ref[2] += s.reshape(-1, SUBLANES, LANES).sum(axis=0)   # z_sum

        @pl.when(i == pl.num_programs(0) - 1)
        def _():
            smooth = jnp.float32(1e-05)
            intersect = jnp.sum(acc_ref[0])
            y_sum = jnp.sum(acc_ref[1])
            z_sum = jnp.sum(acc_ref[2])
            loss = (2.0 * intersect + smooth) / (z_sum + y_sum + smooth)
            out_ref[0, 0] = 1.0 - loss

    return kernel


def _to_slab(x):
    """Flatten to a (rows, 128) slab in the array's native dtype."""
    flat = jnp.ravel(x)
    n = flat.shape[0]
    rem = n % LANES
    if rem:
        # Only needed when the element count is not a multiple of 128.
        # TODO(synk): handle the <128-element tail separately to avoid this
        # full-array pad copy for non-128-multiple inputs.
        flat = jnp.pad(flat, (0, LANES - rem))
    return flat.reshape(-1, LANES)


def dice_loss(score, target):
    """Pallas implementation of DiceLoss.forward(score, target) -> scalar f32."""
    s2d = _to_slab(score)
    t2d = _to_slab(target)
    rows = s2d.shape[0]

    tile_rows = min(MAX_TILE_ROWS, _round_up(rows, SUBLANES))
    steps = pl.cdiv(rows, tile_rows)
    need_mask = (steps * tile_rows) != rows

    kernel = _make_dice_kernel(tile_rows, rows, need_mask)

    out = pl.pallas_call(
        kernel,
        out_shape=jax.ShapeDtypeStruct((1, 1), jnp.float32),
        grid_spec=pltpu.PrefetchScalarGridSpec(
            num_scalar_prefetch=0,
            grid=(steps,),
            in_specs=[
                pl.BlockSpec((tile_rows, LANES), lambda i: (i, 0)),
                pl.BlockSpec((tile_rows, LANES), lambda i: (i, 0)),
            ],
            out_specs=pl.BlockSpec(memory_space=pltpu.SMEM),
            scratch_shapes=[pltpu.VMEM((3, SUBLANES, LANES), jnp.float32)],
        ),
        compiler_params=pltpu.CompilerParams(
            dimension_semantics=("arbitrary",),
        ),
    )(s2d, t2d)
    return out[0, 0]


def dice_loss_ref(score, target):
    """Pure-JAX reference mirroring the PyTorch module exactly."""
    target = target.astype(jnp.float32)
    score = score.astype(jnp.float32)
    smooth = 1e-05
    intersect = jnp.sum(score * target)
    y_sum = jnp.sum(target)
    z_sum = jnp.sum(score)
    loss = (2 * intersect + smooth) / (z_sum + y_sum + smooth)
    return 1 - loss


if __name__ == "__main__":
    key = jax.random.PRNGKey(0)
    k1, k2 = jax.random.split(key)

    # NCHW inputs, consistent with a segmentation head output + binary target.
    score = jax.nn.sigmoid(jax.random.normal(k1, (2, 4, 16, 16), dtype=jnp.float32))
    target = (jax.random.uniform(k2, (2, 4, 16, 16)) > 0.5).astype(jnp.float32)

    loss = jax.block_until_ready(dice_loss(score, target))
    ref = jax.block_until_ready(dice_loss_ref(score, target))
    assert jnp.allclose(loss, ref, rtol=1e-5, atol=1e-6), (loss, ref)

    # Also exercise a larger, multi-tile, ragged-tail case to cover the
    # big-tile + mask path (rows not a multiple of the tile).
    k3, k4 = jax.random.split(k1)
    score2 = jax.nn.sigmoid(jax.random.normal(k3, (3, 4, 72, 128), dtype=jnp.float32))
    target2 = (jax.random.uniform(k4, (3, 4, 72, 128)) > 0.5).astype(jnp.float32)
    loss2 = jax.block_until_ready(dice_loss(score2, target2))
    ref2 = jax.block_until_ready(dice_loss_ref(score2, target2))
    assert jnp.allclose(loss2, ref2, rtol=1e-5, atol=1e-6), (loss2, ref2)

    print("KERNEL_OK")
</pallas_src>

<mosaic_0001>
module attributes {stable_mosaic.version = 11 : i64} {
  func.func @kernel(%arg0: i32, %arg1: memref<16x128xf32, #tpu.memory_space<vmem>>, %arg2: memref<16x128xf32, #tpu.memory_space<vmem>>, %arg3: memref<1x1xf32, #tpu.memory_space<smem>>, %arg4: memref<3x8x128xf32, #tpu.memory_space<vmem>>) attributes {dimension_semantics = [#tpu.dimension_semantics<arbitrary>], iteration_bounds = array<i64: 1>, scalar_prefetch = 0 : i64, scratch_operands = 1 : i64, tpu.core_type = #tpu.core_type<tc>, window_params = [{transform_indices = @transform_0, window_bounds = array<i64: 16, 128>}, {transform_indices = @transform_1, window_bounds = array<i64: 16, 128>}, {transform_indices = @transform_2, window_bounds = array<i64: 1, 1>}]} {
    %c0_i32 = arith.constant 0 : i32
    %0 = arith.cmpi eq, %arg0, %c0_i32 : i32
    %1 = arith.extui %0 : i1 to i32
    %c0_i32_0 = arith.constant 0 : i32
    %2 = arith.cmpi ne, %1, %c0_i32_0 : i32
    scf.if %2 {
      %cst_24 = arith.constant 0.000000e+00 : f32
      %33 = vector.broadcast %cst_24 : f32 to vector<3x8x128xf32>
      %c0_25 = arith.constant 0 : index
      %c0_26 = arith.constant 0 : index
      %c0_27 = arith.constant 0 : index
      %34 = vector.load %arg4[%c0_25, %c0_26, %c0_27] : memref<3x8x128xf32, #tpu.memory_space<vmem>>, vector<3x8x128xf32>
      tpu.vector_store %arg4[%c0_25, %c0_26, %c0_27], %33 {strides = array<i32>} : memref<3x8x128xf32, #tpu.memory_space<vmem>>, vector<3x8x128xf32>,
    } else {
    }
    %c0 = arith.constant 0 : index
    %c0_1 = arith.constant 0 : index
    %3 = vector.load %arg1[%c0, %c0_1] : memref<16x128xf32, #tpu.memory_space<vmem>>, vector<16x128xf32>
    %c0_2 = arith.constant 0 : index
    %c0_3 = arith.constant 0 : index
    %4 = vector.load %arg2[%c0_2, %c0_3] : memref<16x128xf32, #tpu.memory_space<vmem>>, vector<16x128xf32>
    %5 = arith.mulf %3, %4 : vector<16x128xf32>
    %c0_4 = arith.constant 0 : index
    %c0_5 = arith.constant 0 : index
    %c0_6 = arith.constant 0 : index
    %6 = vector.load %arg4[%c0_4, %c0_5, %c0_6] : memref<3x8x128xf32, #tpu.memory_space<vmem>>, vector<1x8x128xf32>
    %7 = vector.shape_cast %6 : vector<1x8x128xf32> to vector<8x128xf32>
    %8 = vector.shape_cast %5 : vector<16x128xf32> to vector<2x8x128xf32>
    %cst = arith.constant dense<0.000000e+00> : vector<8x128xf32>
    %9 = vector.multi_reduction <add>, %8, %cst [0] : vector<2x8x128xf32> to vector<8x128xf32>
    %10 = arith.addf %7, %9 : vector<8x128xf32>
    %c0_7 = arith.constant 0 : index
    %c0_8 = arith.constant 0 : index
    %c0_9 = arith.constant 0 : index
    %11 = vector.load %arg4[%c0_7, %c0_8, %c0_9] : memref<3x8x128xf32, #tpu.memory_space<vmem>>, vector<1x8x128xf32>
    %12 = vector.shape_cast %11 : vector<1x8x128xf32> to vector<8x128xf32>
    %13 = vector.shape_cast %10 : vector<8x128xf32> to vector<1x8x128xf32>
    tpu.vector_store %arg4[%c0_7, %c0_8, %c0_9], %13 {strides = array<i32>} : memref<3x8x128xf32, #tpu.memory_space<vmem>>, vector<1x8x128xf32>,
    %c1 = arith.constant 1 : index
    %c0_10 = arith.constant 0 : index
    %c0_11 = arith.constant 0 : index
    %14 = vector.load %arg4[%c1, %c0_10, %c0_11] : memref<3x8x128xf32, #tpu.memory_space<vmem>>, vector<1x8x128xf32>
    %15 = vector.shape_cast %14 : vector<1x8x128xf32> to vector<8x128xf32>
    %16 = vector.shape_cast %4 : vector<16x128xf32> to vector<2x8x128xf32>
    %cst_12 = arith.constant dense<0.000000e+00> : vector<8x128xf32>
    %17 = vector.multi_reduction <add>, %16, %cst_12 [0] : vector<2x8x128xf32> to vector<8x128xf32>
    %18 = arith.addf %15, %17 : vector<8x128xf32>
    %c1_13 = arith.constant 1 : index
    %c0_14 = arith.constant 0 : index
    %c0_15 = arith.constant 0 : index
    %19 = vector.load %arg4[%c1_13, %c0_14, %c0_15] : memref<3x8x128xf32, #tpu.memory_space<vmem>>, vector<1x8x128xf32>
    %20 = vector.shape_cast %19 : vector<1x8x128xf32> to vector<8x128xf32>
    %21 = vector.shape_cast %18 : vector<8x128xf32> to vector<1x8x128xf32>
    tpu.vector_store %arg4[%c1_13, %c0_14, %c0_15], %21 {strides = array<i32>} : memref<3x8x128xf32, #tpu.memory_space<vmem>>, vector<1x8x128xf32>,
    %c2 = arith.constant 2 : index
    %c0_16 = arith.constant 0 : index
    %c0_17 = arith.constant 0 : index
    %22 = vector.load %arg4[%c2, %c0_16, %c0_17] : memref<3x8x128xf32, #tpu.memory_space<vmem>>, vector<1x8x128xf32>
    %23 = vector.shape_cast %22 : vector<1x8x128xf32> to vector<8x128xf32>
    %24 = vector.shape_cast %3 : vector<16x128xf32> to vector<2x8x128xf32>
    %cst_18 = arith.constant dense<0.000000e+00> : vector<8x128xf32>
    %25 = vector.multi_reduction <add>, %24, %cst_18 [0] : vector<2x8x128xf32> to vector<8x128xf32>
    %26 = arith.addf %23, %25 : vector<8x128xf32>
    %c2_19 = arith.constant 2 : index
    %c0_20 = arith.constant 0 : index
    %c0_21 = arith.constant 0 : index
    %27 = vector.load %arg4[%c2_19, %c0_20, %c0_21] : memref<3x8x128xf32, #tpu.memory_space<vmem>>, vector<1x8x128xf32>
    %28 = vector.shape_cast %27 : vector<1x8x128xf32> to vector<8x128xf32>
    %29 = vector.shape_cast %26 : vector<8x128xf32> to vector<1x8x128xf32>
    tpu.vector_store %arg4[%c2_19, %c0_20, %c0_21], %29 {strides = array<i32>} : memref<3x8x128xf32, #tpu.memory_space<vmem>>, vector<1x8x128xf32>,
    %c0_i32_22 = arith.constant 0 : i32
    %30 = arith.cmpi eq, %arg0, %c0_i32_22 : i32
    %31 = arith.extui %30 : i1 to i32
    %c0_i32_23 = arith.constant 0 : i32
    %32 = arith.cmpi ne, %31, %c0_i32_23 : i32
    scf.if %32 {
      %c0_24 = arith.constant 0 : index
      %c0_25 = arith.constant 0 : index
      %c0_26 = arith.constant 0 : index
      %33 = vector.load %arg4[%c0_24, %c0_25, %c0_26] : memref<3x8x128xf32, #tpu.memory_space<vmem>>, vector<1x8x128xf32>
      %34 = vector.shape_cast %33 : vector<1x8x128xf32> to vector<8x128xf32>
      %35 = vector.shape_cast %34 : vector<8x128xf32> to vector<1x8x128xf32>
      %cst_27 = arith.constant dense<0.000000e+00> : vector<1xf32>
      %36 = vector.multi_reduction <add>, %35, %cst_27 [1, 2] : vector<1x8x128xf32> to vector<1xf32>
      %37 = vector.shape_cast %36 : vector<1xf32> to vector<1x1x1xf32>
      %38 = vector.extract %37[0, 0, 0] : f32 from vector<1x1x1xf32>
      %c1_28 = arith.constant 1 : index
      %c0_29 = arith.constant 0 : index
      %c0_30 = arith.constant 0 : index
      %39 = vector.load %arg4[%c1_28, %c0_29, %c0_30] : memref<3x8x128xf32, #tpu.memory_space<vmem>>, vector<1x8x128xf32>
      %40 = vector.shape_cast %39 : vector<1x8x128xf32> to vector<8x128xf32>
      %41 = vector.shape_cast %40 : vector<8x128xf32> to vector<1x8x128xf32>
      %cst_31 = arith.constant dense<0.000000e+00> : vector<1xf32>
      %42 = vector.multi_reduction <add>, %41, %cst_31 [1, 2] : vector<1x8x128xf32> to vector<1xf32>
      %43 = vector.shape_cast %42 : vector<1xf32> to vector<1x1x1xf32>
      %44 = vector.extract %43[0, 0, 0] : f32 from vector<1x1x1xf32>
      %c2_32 = arith.constant 2 : index
      %c0_33 = arith.constant 0 : index
      %c0_34 = arith.constant 0 : index
      %45 = vector.load %arg4[%c2_32, %c0_33, %c0_34] : memref<3x8x128xf32, #tpu.memory_space<vmem>>, vector<1x8x128xf32>
      %46 = vector.shape_cast %45 : vector<1x8x128xf32> to vector<8x128xf32>
      %47 = vector.shape_cast %46 : vector<8x128xf32> to vector<1x8x128xf32>
      %cst_35 = arith.constant dense<0.000000e+00> : vector<1xf32>
      %48 = vector.multi_reduction <add>, %47, %cst_35 [1, 2] : vector<1x8x128xf32> to vector<1xf32>
      %49 = vector.shape_cast %48 : vector<1xf32> to vector<1x1x1xf32>
      %50 = vector.extract %49[0, 0, 0] : f32 from vector<1x1x1xf32>
      %cst_36 = arith.constant 2.000000e+00 : f32
      %51 = arith.mulf %cst_36, %38 : f32
      %cst_37 = arith.constant 9.99999974E-6 : f32
      %52 = arith.addf %51, %cst_37 : f32
      %53 = arith.addf %50, %44 : f32
      %cst_38 = arith.constant 9.99999974E-6 : f32
      %54 = arith.addf %53, %cst_38 : f32
      %55 = arith.divf %52, %54 : f32
      %cst_39 = arith.constant 1.000000e+00 : f32
      %56 = arith.subf %cst_39, %55 : f32
      %c0_40 = arith.constant 0 : index
      %c0_41 = arith.constant 0 : index
      %57 = memref.load %arg3[%c0_40, %c0_41] : memref<1x1xf32, #tpu.memory_space<smem>>
      memref.store %56, %arg3[%c0_40, %c0_41] : memref<1x1xf32, #tpu.memory_space<smem>>
    } else {
    }
    return
  }
  func.func @transform_0(%arg0: i32) -> (i32, i32) {
    %c0_i32 = arith.constant 0 : i32
    %c0_i32_0 = arith.constant 0 : i32
    return %arg0, %c0_i32 : i32, i32
  }
  func.func @transform_1(%arg0: i32) -> (i32, i32) {
    %c0_i32 = arith.constant 0 : i32
    %c0_i32_0 = arith.constant 0 : i32
    return %arg0, %c0_i32 : i32, i32
  }
  func.func @transform_2(%arg0: i32) -> (i32, i32) {
    %c0_i32 = arith.constant 0 : i32
    %c0_i32_0 = arith.constant 0 : i32
    %c0_i32_1 = arith.constant 0 : i32
    return %c0_i32, %c0_i32_0 : i32, i32
  }
}

</mosaic_0001>

<bundles_post_ra>
// kernel: tpu_custom_call.1
= control target key start
LH: loop header
LB: loop body
LE: loop exit
PB: predicated region body
PF: predicated region fallthrough
CT: control target
= control target key end

     0   :  { %7 = vsyncpa [#allocation4], 0  ;;  %s255_s0 = inlined_call_operand.hbm [shape: f32[16,128], index: 0, kind: input, shape index: {}]   ;;  %s256_s1 = inlined_call_operand.hbm [shape: f32[16,128], index: 1, kind: input, shape index: {}]   ;;  %s257_s2 = inlined_call_operand.hbm [shape: f32[1,1], index: 2, kind: output, shape index: {}]  }
   0x1   :  { %8 = vsyncpa [#allocation7], 0 }
   0x2   :  { %9 = vsyncpa [#allocation5], 0  ;;  %s14_s11 = sshll.u32 %s255_s0, 4  ;;  %s226_s12 = smov [#allocation3]   ;;  %s15_s11 = int_to_ptr.hbm [resolvable:$true] %s14_s11 }
   0x3   :  { %s16_s13 = sshll.u32 %s226_s12, 4  ;;  %s27_s16 = sshll.u32 %s256_s1, 4  ;;  %s17_s13 = int_to_ptr.vmem [resolvable:$true] %s16_s13  ;;  %s28_s16 = int_to_ptr.hbm [resolvable:$true] %s27_s16 }
   0x4   :  { %s227_s17 = smov 128   ;;  %s228_s18 = smov 8  }
   0x5   :  { %22 = dma.hbm_to_vmem [thread:$0]  %s15_s11, 256, %s17_s13, [#allocation4], %s227_s17, %s227_s17, %s228_s18  }
   0x6   :  { %s229_s19 = smov [#allocation6]  }
   0x7   :  { %s29_s20 = sshll.u32 %s229_s19, 4  ;;  %s30_s20 = int_to_ptr.vmem [resolvable:$true] %s29_s20 }
   0x8   :  { %35 = dma.hbm_to_vmem [thread:$0]  %s28_s16, 256, %s30_s20, [#allocation7], %s227_s17, %s227_s17, %s228_s18  }
   0x9   :  { %220 = dma.done.wait [#allocation4], 256  }
   0xa   :  { %221 = vsyncadd [#allocation4], 4294967040 }
   0xb   :  { %222 = dma.done.wait [#allocation7], 256  }
   0xc   :  { %223 = vsyncadd [#allocation7], 4294967040  ;;  %v51_v0 = vld [vmem:[#allocation3] sm:$0xff]  ;;  %v52_v1 = vld [vmem:[#allocation3 + $0x8] sm:$0xff]  ;;  %s133_s28 = sshll.u32 %s257_s2, 4  ;;  %s230_s4 = smov [#allocation8]   ;;  %s134_s28 = int_to_ptr.hbm [resolvable:$true] %s133_s28 }
   0xd   :  { %v53_v2 = vld [vmem:[#allocation6] sm:$0xff]  ;;  %v54_v3 = vld [vmem:[#allocation6 + $0x8] sm:$0xff]  ;;  %v68_v5 = vadd.f32 %v52_v1, %v51_v0 }
   0xe   :  { %v55_v4 = vmul.f32 %v53_v2, %v51_v0  ;;  %v56_v6 = vmul.f32 %v54_v3, %v52_v1  ;;  %v63_v8 = vadd.f32 %v54_v3, %v53_v2 }
   0xf   :  { %95 = vadd.xlane.f32.xlu1 %v68_v5 }
  0x10   :  { %v58_v7 = vadd.f32 %v56_v6, %v55_v4 }
  0x12   :  { %75 = vadd.xlane.f32.xlu0 %v58_v7 }
  0x1a   :  { %85 = vadd.xlane.f32.xlu0 %v63_v8 }
  0x82   :  { %v96_v9 = vpop.xlane.xlu1 %95 }
  0x83   :  { %v97_v11 = vrot.slane %v96_v9, 4 }
  0x85   :  { %v76_v10 = vpop.xlane.xlu0 %75  ;;  %v98_v14 = vadd.f32 %v97_v11, %v96_v9 }
  0x86   :  { %v77_v12 = vrot.slane %v76_v10, 4 }
  0x87   :  { %v99_v17 = vrot.slane %v98_v14, 2 }
  0x88   :  { %v78_v13 = vadd.f32 %v77_v12, %v76_v10 }
  0x89   :  { %v100_v23 = vadd.f32 %v99_v17, %v98_v14 }
  0x8a   :  { %v79_v15 = vrot.slane %v78_v13, 2 }
  0x8b   :  { %v101_v26 = vrot.slane %v100_v23, 1 }
  0x8c   :  { %v80_v16 = vadd.f32 %v79_v15, %v78_v13 }
  0x8d   :  { %v86_v18 = vpop.xlane.xlu0 %85  ;;  %v102_v29 = vadd.f32 %v101_v26, %v100_v23 }
  0x8e   :  { %v87_v19 = vrot.slane %v86_v18, 4  ;;  %v81_v20 = vrot.slane %v80_v16, 1 }
  0x90   :  { %v88_v21 = vadd.f32 %v87_v19, %v86_v18  ;;  %v82_v22 = vadd.f32 %v81_v20, %v80_v16 }
  0x92   :  { %v89_v24 = vrot.slane %v88_v21, 2  ;;  %145 = vpush %v82_v22 }
  0x94   :  { %v90_v25 = vadd.f32 %v89_v24, %v88_v21 }
  0x96   :  { %v91_v27 = vrot.slane %v90_v25, 1 }
  0x98   :  { %v92_v28 = vadd.f32 %v91_v27, %v90_v25 }
  0x9a   :  { %147 = vpush %v92_v28 }
  0x9b   :  { %149 = vpush %v102_v29 }
  0xc3   :  { %s146_s0 = spop %145 }
  0xc4   :  { %s104_s24 = smul.f32 2.0, %s146_s0 }
  0xc6   :  { %s105_s25 = sadd.f32 1e-05, %s104_s24 }
  0xcb   :  { %s148_s1 = spop %147 }
  0xcc   :  { %s150_s21 = spop %149 }
  0xcd   :  { %s106_s22 = sadd.f32 %s150_s21, %s148_s1 }
  0xcf   :  { %s107_s23 = sadd.f32 1e-05, %s106_s22 }
  0xd1   :  { %v108_v30 = vstv %s107_s23 }
  0xd2   :  { %158 = vrcp.f32 %v108_v30  ;;  %v120_v34 = vand.u32 2147483648, %v108_v30  ;;  %v118_v36 = vand.u32 2147483647, %v108_v30  ;;  %vm114_vm1 = vweird.f32 %v108_v30 }
  0xd4   :  { %v121_v38 = vor.u32 1.1754944e-38, %v120_v34  ;;  %vm119_vm3 = vcmp.eq.f32.partialorder %v118_v36, 8.507059e+37 }
  0xd8   :  { %v159_v31 = vpop.eup %158 }
  0xd9   :  { %v110_v32 = vmul.f32 %v159_v31, %v108_v30  ;;  %vm115_vm0 = vweird.f32 %v159_v31 }
  0xda   :  { %vm116_vm2 = vmor %vm114_vm1, %vm115_vm0 }
  0xdb   :  { %v111_v33 = vsub.f32 1.0, %v110_v32 }
  0xdd   :  { %v112_v35 = vmul.f32 %v159_v31, %v111_v33 }
  0xdf   :  { %v113_v37 = vadd.f32 %v159_v31, %v112_v35 }
  0xe1   :  { %v117_v39 = vsel %vm116_vm2, %v159_v31, %v113_v37 }
  0xe2   :  { %v122_v40 = vsel %vm119_vm3, %v121_v38, %v117_v39 }
  0xe3   :  { %151 = vpush %v122_v40 }
 0x114   :  { %s152_s29 = spop %151 }
 0x115   :  { %s124_s30 = smul.f32 %s152_s29, %s105_s25 }
 0x117   :  { %s125_s3 = ssub.f32 1.0, %s124_s30 }
 0x119   :  { %127 = sst [smem:[#allocation8]] %s125_s3 }
 0x11a   :  { %136 = dma.smem_to_hbm %s230_s4, 16, %s134_s28, [#allocation5]  }
 0x11b   :  { %224 = dma.done.wait [#allocation5], 16  }
 0x11c   :  { %225 = vsyncadd [#allocation5], 4294967280 }
 0x11d   :  { %141 = sfence }
 0x11e   :  { %142 = vsyncpa [#allocation4], 1 }
 0x11f   :  { %143 = vsyncpa [#allocation7], 1 }
 0x120   :  { %144 = vsyncpa [#allocation5], 1 }

</bundles_post_ra>
